<compile_context>
chip_gen: v5e
topology: v5e:2x2
jax: 0.10.0
libtpu: 0.0.40
codegen_flags: <defaults>
</compile_context>

<pallas_src>
import functools

import jax
import jax.numpy as jnp
from jax.experimental import pallas as pl
from jax.experimental.pallas import tpu as pltpu

_LANE = 128
_SUBLANE_BF16 = 16   # bf16 packs 16 rows per vreg sublane group


def _round_up(a, b):
    return (a + b - 1) // b * b


# --------------------------------------------------------------------------
# Kernel
# --------------------------------------------------------------------------
def _lstm_fc_kernel(x_ref, w_gates_ref, b_gates_ref, w_fc_ref, b_fc_ref,
                    out_ref, *, hidden_padded, hidden_chunk):
    """Fused single-step LSTM (zero initial state) + Linear head.

    x_ref:       (Bt, I)     f32 input tile (cast to bf16 in-kernel)
    w_gates_ref: (I, 3*Hp)   bf16, pre-transposed, gate order [i | g | o],
                             each gate zero-padded to Hp (multiple of 128)
    b_gates_ref: (1, 3*Hp)   f32, b_ih + b_hh (padded, f-gate removed)
    w_fc_ref:    (Hp, O)     bf16, pre-transposed fc weight (zero-padded rows)
    b_fc_ref:    (1, O)      f32 fc bias
    out_ref:     (Bt, O)     f32 output tile (unpadded last dim)
    """
    hp = hidden_padded
    x = x_ref[...].astype(jnp.bfloat16)          # in-kernel cast (VPU, hidden)
    acc = jnp.zeros(out_ref.shape, jnp.float32)

    # Static (trace-time) chunking over the hidden dimension keeps live
    # intermediates to (Bt, hc) instead of (Bt, 3*Hp).
    lo = 0
    while lo < hp:
        hc = min(hidden_chunk, hp - lo)

        def gate(base):
            g = jnp.dot(x, w_gates_ref[:, base + lo:base + lo + hc],
                        preferred_element_type=jnp.float32)
            return g + b_gates_ref[:, base + lo:base + lo + hc]

        i_g = jax.nn.sigmoid(gate(0))
        g_g = jnp.tanh(gate(hp))
        o_g = jax.nn.sigmoid(gate(2 * hp))

        c1 = i_g * g_g                 # f * c0 term is exactly zero (c0 == 0)
        h1 = o_g * jnp.tanh(c1)        # padded lanes stay exactly 0.0

        acc = acc + jnp.dot(h1.astype(jnp.bfloat16),
                            w_fc_ref[lo:lo + hc, :],
                            preferred_element_type=jnp.float32)
        lo += hc

    out_ref[...] = (acc + b_fc_ref[...]).astype(out_ref.dtype)


# --------------------------------------------------------------------------
# One-time weight packing (hoisted out of the per-call path)
# --------------------------------------------------------------------------
def pack_lstm_params(params):
    """Repack PyTorch-layout params once; forward calls reuse the result."""
    w_ih = params["w_ih"]          # (4H, I)  PyTorch gate order i, f, g, o
    b_ih = params["b_ih"]          # (4H,)
    b_hh = params["b_hh"]          # (4H,)
    w_fc = params["w_fc"]          # (O, H)
    b_fc = params["b_fc"]          # (O,)
    # params["w_hh"] is unused at runtime: h0 == 0 makes its contribution zero.

    H = w_ih.shape[0] // 4
    O = w_fc.shape[0]
    Hp = _round_up(H, _LANE)       # per-gate lane-padded width
    # NOTE: for H << 128 per-gate padding wastes VPU/EUP lanes; acceptable for
    # the intended (H % 128 == 0) configurations and for the tiny smoke test.

    def pad_cols(w_t):             # (I, H) -> (I, Hp)
        return jnp.pad(w_t, ((0, 0), (0, Hp - H)))

    def pad_vec(v):                # (H,) -> (Hp,)
        return jnp.pad(v, (0, Hp - H))

    # Drop the dead forget gate, transpose to (I, H), pad each gate to Hp.
    w_gates_t = jnp.concatenate(
        [pad_cols(w_ih[0 * H:1 * H, :].T),
         pad_cols(w_ih[2 * H:3 * H, :].T),
         pad_cols(w_ih[3 * H:4 * H, :].T)],
        axis=1).astype(jnp.bfloat16)                       # (I, 3*Hp) bf16

    b = (b_ih + b_hh).astype(jnp.float32)
    b_gates = jnp.concatenate(
        [pad_vec(b[0 * H:1 * H]),
         pad_vec(b[2 * H:3 * H]),
         pad_vec(b[3 * H:4 * H])]).reshape(1, 3 * Hp)      # (1, 3*Hp) f32

    w_fc_t = jnp.pad(w_fc.T.astype(jnp.float32),
                     ((0, Hp - H), (0, 0))).astype(jnp.bfloat16)   # (Hp, O)
    b_fc_p = b_fc.astype(jnp.float32).reshape(1, O)                # (1, O)

    return {"w_gates_t": w_gates_t, "b_gates": b_gates,
            "w_fc_t": w_fc_t, "b_fc": b_fc_p}


# --------------------------------------------------------------------------
# Forward
# --------------------------------------------------------------------------
def lstm_model_forward(x, packed, *, batch_tile=512, hidden_chunk=512):
    """x: (B, input_size) f32, packed: output of pack_lstm_params -> (B, O)."""
    w_gates_t = packed["w_gates_t"]
    b_gates = packed["b_gates"]
    w_fc_t = packed["w_fc_t"]
    b_fc = packed["b_fc"]

    B, I = x.shape
    Hp = w_gates_t.shape[1] // 3
    O = w_fc_t.shape[1]
    assert w_gates_t.shape[0] == I

    # Batch tiling: multiples of 16 sublanes (packed bf16 vregs); aim for
    # >= 2 grid steps when B allows so both v7x TensorCores get work.
    b_rows = _round_up(B, _SUBLANE_BF16)
    bt = min(batch_tile, b_rows)
    if b_rows >= 2 * _SUBLANE_BF16:
        bt = min(bt, _round_up(pl.cdiv(b_rows, 2), _SUBLANE_BF16))
    bt = _round_up(max(bt, _SUBLANE_BF16), _SUBLANE_BF16)
    Bp = _round_up(B, bt)
    grid = Bp // bt

    x_p = jnp.pad(x, ((0, Bp - B), (0, 0)))        # stays f32; cast in-kernel

    hc = _round_up(min(hidden_chunk, Hp), _LANE)
    kernel = functools.partial(_lstm_fc_kernel,
                               hidden_padded=Hp, hidden_chunk=hc)

    # Advisory cost estimate for XLA scheduling around the custom call.
    flops = 2 * Bp * I * 3 * Hp + 2 * Bp * Hp * O + 6 * Bp * Hp
    transcendentals = 4 * Bp * Hp
    bytes_accessed = (Bp * I * 4 + Bp * O * 4
                      + grid * (w_gates_t.size * 2 + b_gates.size * 4
                                + w_fc_t.size * 2 + b_fc.size * 4))

    # Scoped-VMEM hint: double-buffered blocks + live in-kernel intermediates.
    o_lanes = _round_up(O, _LANE)
    vmem_est = (2 * (bt * I * 4 + w_gates_t.size * 2 + b_gates.size * 4
                     + w_fc_t.size * 2 + b_fc.size * 4 + bt * o_lanes * 4)
                + bt * (6 * hc + o_lanes) * 4)
    vmem_limit = int(min(100 * 2 ** 20, max(32 * 2 ** 20, 2 * vmem_est)))

    out = pl.pallas_call(
        kernel,
        out_shape=jax.ShapeDtypeStruct((Bp, O), jnp.float32),
        grid=(grid,),
        in_specs=[
            pl.BlockSpec((bt, I), lambda i: (i, 0)),
            pl.BlockSpec((I, 3 * Hp), lambda i: (0, 0)),
            pl.BlockSpec((1, 3 * Hp), lambda i: (0, 0)),
            pl.BlockSpec((Hp, O), lambda i: (0, 0)),
            pl.BlockSpec((1, O), lambda i: (0, 0)),
        ],
        out_specs=pl.BlockSpec((bt, O), lambda i: (i, 0)),
        compiler_params=pltpu.CompilerParams(
            dimension_semantics=("parallel",),
            vmem_limit_bytes=vmem_limit),
        cost_estimate=pl.CostEstimate(
            flops=int(flops),
            transcendentals=int(transcendentals),
            bytes_accessed=int(bytes_accessed)),
    )(x_p, w_gates_t, b_gates, w_fc_t, b_fc)

    return out[:B] if Bp != B else out


def make_lstm_forward(params, **kwargs):
    """Pack weights once, return a jitted apply fn over x."""
    packed = pack_lstm_params(params)

    @jax.jit
    def apply_fn(x):
        return lstm_model_forward(x, packed, **kwargs)

    return apply_fn


# --------------------------------------------------------------------------
# Params / references / smoke test
# --------------------------------------------------------------------------
def init_params(key, input_size, hidden_size, output_size):
    """Deterministic init matching PyTorch's uniform(-1/sqrt(H), 1/sqrt(H))."""
    k = 1.0 / jnp.sqrt(jnp.float32(hidden_size))
    keys = jax.random.split(key, 6)
    u = lambda kk, shape: jax.random.uniform(kk, shape, jnp.float32, -k, k)
    return {
        "w_ih": u(keys[0], (4 * hidden_size, input_size)),
        "w_hh": u(keys[1], (4 * hidden_size, hidden_size)),
        "b_ih": u(keys[2], (4 * hidden_size,)),
        "b_hh": u(keys[3], (4 * hidden_size,)),
        "w_fc": u(keys[4], (output_size, hidden_size)),
        "b_fc": u(keys[5], (output_size,)),
    }


def _reference_forward_f32(x, params):
    """Pure-JAX f32 reference of the PyTorch forward."""
    H = params["w_hh"].shape[1]
    gates = x @ params["w_ih"].T + params["b_ih"] + params["b_hh"]
    i = jax.nn.sigmoid(gates[:, 0 * H:1 * H])
    g = jnp.tanh(gates[:, 2 * H:3 * H])
    o = jax.nn.sigmoid(gates[:, 3 * H:4 * H])
    h1 = o * jnp.tanh(i * g)
    return h1 @ params["w_fc"].T + params["b_fc"]


def _reference_forward_mixed(x, params):
    """Reference with the kernel's precision (bf16 MXU operands, f32 math)."""
    H = params["w_hh"].shape[1]
    q = lambda a: a.astype(jnp.bfloat16).astype(jnp.float32)
    gates = q(x) @ q(params["w_ih"]).T + params["b_ih"] + params["b_hh"]
    i = jax.nn.sigmoid(gates[:, 0 * H:1 * H])
    g = jnp.tanh(gates[:, 2 * H:3 * H])
    o = jax.nn.sigmoid(gates[:, 3 * H:4 * H])
    h1 = o * jnp.tanh(i * g)
    return q(h1) @ q(params["w_fc"]).T + params["b_fc"]


if __name__ == "__main__":
    input_size, hidden_size, output_size = 16, 32, 8
    batch = 4

    key = jax.random.PRNGKey(0)
    k_x, k_p = jax.random.split(key)
    x = jax.random.normal(k_x, (batch, input_size), jnp.float32)
    params = init_params(k_p, input_size, hidden_size, output_size)

    fwd = make_lstm_forward(params)          # weight repack happens once here
    out = jax.block_until_ready(fwd(x))
    assert out.shape == (batch, output_size)

    # Tight check vs. a reference with the same mixed-precision choices.
    ref_mixed = _reference_forward_mixed(x, params)
    assert jnp.allclose(out, ref_mixed, atol=2e-3, rtol=2e-3)

    # Looser check vs. the full-f32 PyTorch-equivalent forward
    # (bf16 MXU operands introduce a small, expected quantization error).
    ref_f32 = _reference_forward_f32(x, params)
    assert jnp.allclose(out, ref_f32, atol=5e-2, rtol=5e-2)

    print("KERNEL_OK")
</pallas_src>

<mosaic_0001>
module attributes {stable_mosaic.version = 11 : i64} {
  func.func @_lstm_fc_kernel(%arg0: i32, %arg1: memref<16x16xf32, #tpu.memory_space<vmem>>, %arg2: memref<16x384xbf16, #tpu.memory_space<vmem>>, %arg3: memref<1x384xf32, #tpu.memory_space<vmem>>, %arg4: memref<128x8xbf16, #tpu.memory_space<vmem>>, %arg5: memref<1x8xf32, #tpu.memory_space<vmem>>, %arg6: memref<16x8xf32, #tpu.memory_space<vmem>>) attributes {dimension_semantics = [#tpu.dimension_semantics<parallel>], iteration_bounds = array<i64: 1>, scalar_prefetch = 0 : i64, scratch_operands = 0 : i64, tpu.core_type = #tpu.core_type<tc>, window_params = [{transform_indices = @transform_0, window_bounds = array<i64: 16, 16>}, {pipeline_mode = #tpu.pipeline_mode<synchronous>, transform_indices = @transform_1, window_bounds = array<i64: 16, 384>}, {pipeline_mode = #tpu.pipeline_mode<synchronous>, transform_indices = @transform_2, window_bounds = array<i64: 1, 384>}, {pipeline_mode = #tpu.pipeline_mode<synchronous>, transform_indices = @transform_3, window_bounds = array<i64: 128, 8>}, {pipeline_mode = #tpu.pipeline_mode<synchronous>, transform_indices = @transform_4, window_bounds = array<i64: 1, 8>}, {transform_indices = @transform_5, window_bounds = array<i64: 16, 8>}]} {
    %c0 = arith.constant 0 : index
    %c0_0 = arith.constant 0 : index
    %0 = vector.load %arg1[%c0, %c0_0] : memref<16x16xf32, #tpu.memory_space<vmem>>, vector<16x16xf32>
    %1 = arith.truncf %0 : vector<16x16xf32> to vector<16x16xbf16>
    %cst = arith.constant 0.000000e+00 : f32
    %2 = vector.broadcast %cst : f32 to vector<16x8xf32>
    %c0_1 = arith.constant 0 : index
    %c0_2 = arith.constant 0 : index
    %3 = vector.load %arg2[%c0_1, %c0_2] : memref<16x384xbf16, #tpu.memory_space<vmem>>, vector<16x128xbf16>
    %cst_3 = arith.constant dense<0.000000e+00> : vector<16x128xf32>
    %4 = tpu.matmul %1, %3, %cst_3 {dimension_numbers = #tpu.dot_dimension_numbers<[1], [0], [0], [1], [0, 0, 1, 1], [], []>} : vector<16x16xbf16>, vector<16x128xbf16>, vector<16x128xf32> -> vector<16x128xf32>
    %c0_4 = arith.constant 0 : index
    %c0_5 = arith.constant 0 : index
    %5 = vector.load %arg3[%c0_4, %c0_5] : memref<1x384xf32, #tpu.memory_space<vmem>>, vector<1x128xf32>
    %6 = vector.broadcast %5 : vector<1x128xf32> to vector<16x128xf32>
    %7 = arith.addf %4, %6 : vector<16x128xf32>
    %8 = arith.negf %7 : vector<16x128xf32>
    %9 = math.exp %8 : vector<16x128xf32>
    %cst_6 = arith.constant 1.000000e+00 : f32
    %10 = vector.broadcast %cst_6 : f32 to vector<16x128xf32>
    %11 = arith.addf %10, %9 : vector<16x128xf32>
    %12 = arith.divf %10, %11 : vector<16x128xf32>
    %c0_7 = arith.constant 0 : index
    %c128 = arith.constant 128 : index
    %13 = vector.load %arg2[%c0_7, %c128] : memref<16x384xbf16, #tpu.memory_space<vmem>>, vector<16x128xbf16>
    %cst_8 = arith.constant dense<0.000000e+00> : vector<16x128xf32>
    %14 = tpu.matmul %1, %13, %cst_8 {dimension_numbers = #tpu.dot_dimension_numbers<[1], [0], [0], [1], [0, 0, 1, 1], [], []>} : vector<16x16xbf16>, vector<16x128xbf16>, vector<16x128xf32> -> vector<16x128xf32>
    %c0_9 = arith.constant 0 : index
    %c128_10 = arith.constant 128 : index
    %15 = vector.load %arg3[%c0_9, %c128_10] : memref<1x384xf32, #tpu.memory_space<vmem>>, vector<1x128xf32>
    %16 = vector.broadcast %15 : vector<1x128xf32> to vector<16x128xf32>
    %17 = arith.addf %14, %16 : vector<16x128xf32>
    %18 = math.tanh %17 : vector<16x128xf32>
    %c0_11 = arith.constant 0 : index
    %c256 = arith.constant 256 : index
    %19 = vector.load %arg2[%c0_11, %c256] : memref<16x384xbf16, #tpu.memory_space<vmem>>, vector<16x128xbf16>
    %cst_12 = arith.constant dense<0.000000e+00> : vector<16x128xf32>
    %20 = tpu.matmul %1, %19, %cst_12 {dimension_numbers = #tpu.dot_dimension_numbers<[1], [0], [0], [1], [0, 0, 1, 1], [], []>} : vector<16x16xbf16>, vector<16x128xbf16>, vector<16x128xf32> -> vector<16x128xf32>
    %c0_13 = arith.constant 0 : index
    %c256_14 = arith.constant 256 : index
    %21 = vector.load %arg3[%c0_13, %c256_14] : memref<1x384xf32, #tpu.memory_space<vmem>>, vector<1x128xf32>
    %22 = vector.broadcast %21 : vector<1x128xf32> to vector<16x128xf32>
    %23 = arith.addf %20, %22 : vector<16x128xf32>
    %24 = arith.negf %23 : vector<16x128xf32>
    %25 = math.exp %24 : vector<16x128xf32>
    %cst_15 = arith.constant 1.000000e+00 : f32
    %26 = vector.broadcast %cst_15 : f32 to vector<16x128xf32>
    %27 = arith.addf %26, %25 : vector<16x128xf32>
    %28 = arith.divf %26, %27 : vector<16x128xf32>
    %29 = arith.mulf %12, %18 : vector<16x128xf32>
    %30 = math.tanh %29 : vector<16x128xf32>
    %31 = arith.mulf %28, %30 : vector<16x128xf32>
    %32 = arith.truncf %31 : vector<16x128xf32> to vector<16x128xbf16>
    %c0_16 = arith.constant 0 : index
    %c0_17 = arith.constant 0 : index
    %33 = vector.load %arg4[%c0_16, %c0_17] : memref<128x8xbf16, #tpu.memory_space<vmem>>, vector<128x8xbf16>
    %cst_18 = arith.constant dense<0.000000e+00> : vector<16x8xf32>
    %34 = tpu.matmul %32, %33, %cst_18 {dimension_numbers = #tpu.dot_dimension_numbers<[1], [0], [0], [1], [0, 0, 1, 1], [], []>} : vector<16x128xbf16>, vector<128x8xbf16>, vector<16x8xf32> -> vector<16x8xf32>
    %35 = arith.addf %2, %34 : vector<16x8xf32>
    %c0_19 = arith.constant 0 : index
    %c0_20 = arith.constant 0 : index
    %36 = vector.load %arg5[%c0_19, %c0_20] : memref<1x8xf32, #tpu.memory_space<vmem>>, vector<1x8xf32>
    %37 = vector.broadcast %36 : vector<1x8xf32> to vector<16x8xf32>
    %38 = arith.addf %35, %37 : vector<16x8xf32>
    %c0_21 = arith.constant 0 : index
    %c0_22 = arith.constant 0 : index
    %39 = vector.load %arg6[%c0_21, %c0_22] : memref<16x8xf32, #tpu.memory_space<vmem>>, vector<16x8xf32>
    tpu.vector_store %arg6[%c0_21, %c0_22], %38 {strides = array<i32>} : memref<16x8xf32, #tpu.memory_space<vmem>>, vector<16x8xf32>,
    return
  }
  func.func @transform_0(%arg0: i32) -> (i32, i32) {
    %c0_i32 = arith.constant 0 : i32
    %c0_i32_0 = arith.constant 0 : i32
    return %arg0, %c0_i32 : i32, i32
  }
  func.func @transform_1(%arg0: i32) -> (i32, i32) {
    %c0_i32 = arith.constant 0 : i32
    %c0_i32_0 = arith.constant 0 : i32
    %c0_i32_1 = arith.constant 0 : i32
    return %c0_i32, %c0_i32_0 : i32, i32
  }
  func.func @transform_2(%arg0: i32) -> (i32, i32) {
    %c0_i32 = arith.constant 0 : i32
    %c0_i32_0 = arith.constant 0 : i32
    %c0_i32_1 = arith.constant 0 : i32
    return %c0_i32, %c0_i32_0 : i32, i32
  }
  func.func @transform_3(%arg0: i32) -> (i32, i32) {
    %c0_i32 = arith.constant 0 : i32
    %c0_i32_0 = arith.constant 0 : i32
    %c0_i32_1 = arith.constant 0 : i32
    return %c0_i32, %c0_i32_0 : i32, i32
  }
  func.func @transform_4(%arg0: i32) -> (i32, i32) {
    %c0_i32 = arith.constant 0 : i32
    %c0_i32_0 = arith.constant 0 : i32
    %c0_i32_1 = arith.constant 0 : i32
    return %c0_i32, %c0_i32_0 : i32, i32
  }
  func.func @transform_5(%arg0: i32) -> (i32, i32) {
    %c0_i32 = arith.constant 0 : i32
    %c0_i32_0 = arith.constant 0 : i32
    return %arg0, %c0_i32 : i32, i32
  }
}

</mosaic_0001>

<bundles_post_ra>
// kernel: apply_fn.1
= control target key start
LH: loop header
LB: loop body
LE: loop exit
PB: predicated region body
PF: predicated region fallthrough
CT: control target
= control target key end

     0   :  { %10 = vsyncpa [#allocation3], 0  ;;  %s535_s0 = inlined_call_operand.vmem [shape: f32[16,16], index: 0, kind: input, shape index: {}]   ;;  %s536_s1 = inlined_call_operand.hbm [shape: bf16[16,384], index: 1, kind: input, shape index: {}]   ;;  %s537_s2 = inlined_call_operand.vmem [shape: f32[1,384], index: 2, kind: input, shape index: {}]   ;;  %s538_s3 = inlined_call_operand.hbm [shape: bf16[128,8], index: 3, kind: input, shape index: {}]   ;;  %s539_s4 = inlined_call_operand.vmem [shape: f32[1,8], index: 4, kind: input, shape index: {}]   ;;  %s540_s5 = inlined_call_operand.vmem [shape: f32[16,8], index: 5, kind: output, shape index: {}]  }
   0x1   :  { %s18_s20 = sshll.u32 %s536_s1, 4  ;;  %s19_s20 = int_to_ptr.hbm [resolvable:$true] %s18_s20 }
   0x2   :  { %11 = vsyncpa [#allocation5], 0  ;;  %s462_s21 = smov [#allocation2]   ;;  %s33_s25 = sshll.u32 %s538_s3, 4  ;;  %s34_s25 = int_to_ptr.hbm [resolvable:$true] %s33_s25 }
   0x3   :  { %s20_s22 = sshll.u32 %s462_s21, 4  ;;  %s463_s26 = smov 192   ;;  %s21_s22 = int_to_ptr.vmem [resolvable:$true] %s20_s22 }
   0x4   :  { %s464_s27 = smov 12   ;;  %s465_s28 = smov [#allocation4]  }
   0x5   :  { %26 = dma.hbm_to_vmem [thread:$0]  %s19_s20, 384, %s21_s22, [#allocation3], %s463_s26, %s463_s26, %s464_s27  }
   0x6   :  { %s35_s29 = sshll.u32 %s465_s28, 4  ;;  %s466_s30 = smov 64   ;;  %s36_s29 = int_to_ptr.vmem [resolvable:$true] %s35_s29 }
   0x7   :  { %s467_s6 = smov 4  }
   0x8   :  { %41 = dma.hbm_to_vmem [thread:$0]  %s34_s25, 1024, %s36_s29, [#allocation5], %s466_s30, %s466_s30, %s467_s6  }
   0x9   :  { %458 = dma.done.wait [#allocation3], 384  }
   0xa   :  { %459 = vsyncadd [#allocation3], 4294966912 }
   0xb   :  { %460 = dma.done.wait [#allocation5], 1024  }
   0xc   :  { %461 = vsyncadd [#allocation5], 4294966272  ;;  %v316_v0 = vld [vmem:[#allocation2] sm:$0xf]  ;;  %v365_v1 = vld [vmem:[#allocation2 + $0x8] sm:$0xf0] }
   0xd   :  { %v328_v2 = vld [vmem:[#allocation2 + $0x8] sm:$0xf]  ;;  %v317_v3 = vor.u32 %v365_v1, %v316_v0  ;;  %v367_v4 = vld [vmem:[#allocation2 + $0x10] sm:$0xf0]  ;;  %v53_v5 = vld [vmem:[%s535_s0] sm:$0xff]  ;;  %vm68_vm0 = vcmask 130048  }
   0xe   :  { %v54_v6 = vld [vmem:[%s535_s0 + $0x8] sm:$0xff]  ;;  %v329_v7 = vor.u32 %v367_v4, %v328_v2  ;;  %v323_v9 = vld [vmem:[#allocation2 + $0x4] sm:$0xf]  ;;  %v366_v10 = vld [vmem:[#allocation2 + $0xc] sm:$0xf0] }
   0xf   :  { %v55_v8 = vpack.c.bf16 %v54_v6, %v53_v5  ;;  %79 = vmatpush.bf16.msra.mxu0 %v317_v3  ;;  %v324_v11 = vor.u32 %v366_v10, %v323_v9  ;;  %v375_v12 = vld [vmem:[#allocation4 + $0x38] sm:$0xff]  ;;  %v374_v13 = vld [vmem:[#allocation4 + $0x30] sm:$0xff]  ;;  %v373_v14 = vld [vmem:[#allocation4 + $0x28] sm:$0xff] }
  0x10   :  { %171 = vmatpush.bf16.msra.mxu2 %v329_v7  ;;  %291 = vmatpush.bf16.msra.mxu3 %v375_v12  ;;  %v382_v15 = vld [vmem:[%s537_s2] ss:$0 sm:$0xff]  ;;  %v372_v17 = vld [vmem:[#allocation4 + $0x20] sm:$0xff]  ;;  %v383_v20 = vld [vmem:[%s537_s2 + $0x2] ss:$0 sm:$0xff] }
  0x11   :  { %143 = vmatpush.bf16.msra.mxu1 %v324_v11  ;;  %v371_v21 = vld [vmem:[#allocation4 + $0x18] sm:$0xff]  ;;  %v370_v25 = vld [vmem:[#allocation4 + $0x10] sm:$0xff]  ;;  %v369_v28 = vld [vmem:[#allocation4 + $0x8] sm:$0xff] }
  0x12   :  { %318 = vmatmul.msk.bf16.vlgmr.msra.gmra.mxu0 %vm68_vm0, %v55_v8  ;;  %v368_v32 = vld [vmem:[#allocation4] sm:$0xff]  ;;  %v384_v37 = vld [vmem:[%s537_s2 + $0x1] ss:$0 sm:$0xff] }
  0x13   :  { %330 = vmatmul.msk.bf16.vlgmr.msra.gmra.mxu2 %vm68_vm0, %v55_v8 }
  0x14   :  { %325 = vmatmul.msk.bf16.vlgmr.msra.gmra.mxu1 %vm68_vm0, %v55_v8  ;;  %292 = vmatpush.bf16.msra.mxu3 %v374_v13 }
  0x18   :  { %293 = vmatpush.bf16.msra.mxu3 %v373_v14 }
  0x1c   :  { %294 = vmatpush.bf16.msra.mxu3 %v372_v17 }
  0x20   :  { %295 = vmatpush.bf16.msra.mxu3 %v371_v21 }
  0x24   :  { %296 = vmatpush.bf16.msra.mxu3 %v370_v25 }
  0x28   :  { %297 = vmatpush.bf16.msra.mxu3 %v369_v28 }
  0x2c   :  { %298 = vmatpush.bf16.msra.mxu3 %v368_v32  ;;  %v385_v32 = vld [vmem:[%s539_s4] ss:$0 sm:$0xff] }
  0x8f   :  { %v81_v16 = vpop.f32.mrf.mxu0 }
  0x90   :  { %v82_v18 = vadd.f32 %v382_v15, %v81_v16 }
  0x91   :  { %v145_v33 = vpop.f32.mrf.mxu1 }
  0x92   :  { %v319_v19 = vmul.f32 -1.442695, %v82_v18  ;;  %v146_v44 = vadd.f32 %v384_v37, %v145_v33 }
  0x94   :  { %386 = vpow2.f32 %v319_v19 }
  0x96   :  { %v173_v22 = vpop.f32.mrf.mxu2 }
  0x97   :  { %v174_v23 = vadd.f32 %v383_v20, %v173_v22  ;;  %v83_v24 = vpop.f32.mrf.mxu0 }
  0x98   :  { %v84_v26 = vadd.f32 %v382_v15, %v83_v24 }
  0x99   :  { %v331_v27 = vmul.f32 -1.442695, %v174_v23  ;;  %v147_v47 = vpop.f32.mrf.mxu1 }
  0x9a   :  { %v387_v29 = vpop.eup %386  ;;  %v320_v30 = vmul.f32 -1.442695, %v84_v26  ;;  %v148_v55 = vadd.f32 %v384_v37, %v147_v47 }
  0x9b   :  { %v92_v31 = vadd.f32 1.0, %v387_v29  ;;  %388 = vpow2.f32 %v331_v27 }
  0x9c   :  { %390 = vpow2.f32 %v320_v30 }
  0x9d   :  { %392 = vrcp.f32 %v92_v31  ;;  %v105_v49 = vand.u32 2147483648, %v92_v31  ;;  %vm99_vm2 = vweird.f32 %v92_v31  ;;  %v103_v52 = vand.u32 2147483647, %v92_v31 }
  0x9e   :  { %v175_v34 = vpop.f32.mrf.mxu2 }
  0x9f   :  { %v176_v35 = vadd.f32 %v383_v20, %v175_v34  ;;  %v106_v59 = vor.u32 1.1754944e-38, %v105_v49  ;;  %vm104_vm4 = vcmp.eq.f32.partialorder %v103_v52, 8.507059e+37 }
  0xa1   :  { %v389_v36 = vpop.eup %388  ;;  %v332_v38 = vmul.f32 -1.442695, %v176_v35 }
  0xa2   :  { %v391_v39 = vpop.eup %390  ;;  %v519_v40 = vadd.f32 1.0, %v389_v36 }
  0xa3   :  { %v393_v41 = vpop.eup %392  ;;  %v93_v42 = vadd.f32 1.0, %v391_v39  ;;  %394 = vpow2.f32 %v332_v38 }
  0xa4   :  { %v95_v43 = vmul.f32 %v393_v41, %v92_v31  ;;  %396 = vrcp.f32 %v519_v40  ;;  %vm100_vm1 = vweird.f32 %v393_v41  ;;  %vm191_vm11 = vweird.f32 %v519_v40 }
  0xa5   :  { %398 = vrcp.f32 %v93_v42  ;;  %vm101_vm3 = vmor %vm99_vm2, %vm100_vm1  ;;  %v120_v63 = vand.u32 2147483648, %v93_v42  ;;  %v118_v2 = vand.u32 2147483647, %v93_v42  ;;  %vm114_vm6 = vweird.f32 %v93_v42 }
  0xa6   :  { %v96_v45 = vsub.f32 1.0, %v95_v43  ;;  %400 = vtanh.f32 %v146_v44  ;;  %v197_v16 = vand.u32 2147483648, %v519_v40  ;;  %v195_v18 = vand.u32 2147483647, %v519_v40 }
  0xa7   :  { %v121_v6 = vor.u32 1.1754944e-38, %v120_v63  ;;  %vm119_vm8 = vcmp.eq.f32.partialorder %v118_v2, 8.507059e+37  ;;  %vm305_vm1 = vcmask 64512  }
  0xa8   :  { %v97_v46 = vmul.f32 %v393_v41, %v96_v45  ;;  %v198_v24 = vor.u32 1.1754944e-38, %v197_v16  ;;  %vm196_vm15 = vcmp.eq.f32.partialorder %v195_v18, 8.507059e+37 }
  0xa9   :  { %v395_v48 = vpop.eup %394 }
  0xaa   :  { %v397_v50 = vpop.eup %396  ;;  %v98_v51 = vadd.f32 %v393_v41, %v97_v46  ;;  %v185_v53 = vadd.f32 1.0, %v395_v48 }
  0xab   :  { %v399_v54 = vpop.eup %398  ;;  %v187_v56 = vmul.f32 %v397_v50, %v519_v40  ;;  %vm192_vm9 = vweird.f32 %v397_v50 }
  0xac   :  { %v110_v57 = vmul.f32 %v399_v54, %v93_v42  ;;  %v102_v58 = vsel %vm101_vm3, %v393_v41, %v98_v51  ;;  %402 = vrcp.f32 %v185_v53  ;;  %v401_v61 = vpop.eup %400  ;;  %vm115_vm5 = vweird.f32 %v399_v54  ;;  %vm193_vm12 = vmor %vm191_vm11, %vm192_vm9 }
  0xad   :  { %v107_v62 = vsel %vm104_vm4, %v106_v59, %v102_v58  ;;  %404 = vtanh.f32 %v148_v55  ;;  %v188_v0 = vsub.f32 1.0, %v187_v56  ;;  %vm116_vm7 = vmor %vm114_vm6, %vm115_vm5  ;;  %v212_v17 = vand.u32 2147483648, %v185_v53 }
  0xae   :  { %v111_v60 = vsub.f32 1.0, %v110_v57  ;;  %v216_v4 = vmul.f32 %v401_v61, %v107_v62  ;;  %vm206_vm13 = vweird.f32 %v185_v53  ;;  %v210_v20 = vand.u32 2147483647, %v185_v53 }
  0xaf   :  { %v189_v7 = vmul.f32 %v397_v50, %v188_v0  ;;  %v213_v25 = vor.u32 1.1754944e-38, %v212_v17 }
  0xb0   :  { %v112_v1 = vmul.f32 %v399_v54, %v111_v60  ;;  %406 = vtanh.f32 %v216_v4  ;;  %vm211_vm0 = vcmp.eq.f32.partialorder %v210_v20, 8.507059e+37 }
  0xb1   :  { %v190_v14 = vadd.f32 %v397_v50, %v189_v7 }
  0xb2   :  { %v403_v3 = vpop.eup %402  ;;  %v113_v5 = vadd.f32 %v399_v54, %v112_v1 }
  0xb3   :  { %v202_v8 = vmul.f32 %v403_v3, %v185_v53  ;;  %v405_v10 = vpop.eup %404  ;;  %vm207_vm10 = vweird.f32 %v403_v3  ;;  %v194_v21 = vsel %vm193_vm12, %v397_v50, %v190_v14 }
  0xb4   :  { %v117_v9 = vsel %vm116_vm7, %v399_v54, %v113_v5  ;;  %vm208_vm14 = vmor %vm206_vm13, %vm207_vm10  ;;  %v199_v27 = vsel %vm196_vm15, %v198_v24, %v194_v21 }
  0xb5   :  { %v122_v11 = vsel %vm119_vm8, %v121_v6, %v117_v9  ;;  %v203_v12 = vsub.f32 1.0, %v202_v8 }
  0xb6   :  { %v217_v13 = vmul.f32 %v405_v10, %v122_v11  ;;  %v407_v23 = vpop.eup %406 }
  0xb7   :  { %v204_v15 = vmul.f32 %v403_v3, %v203_v12  ;;  %v220_v29 = vmul.f32 %v407_v23, %v199_v27 }
  0xb8   :  { %408 = vtanh.f32 %v217_v13 }
  0xb9   :  { %v205_v19 = vadd.f32 %v403_v3, %v204_v15 }
  0xbb   :  { %v209_v22 = vsel %vm208_vm14, %v403_v3, %v205_v19 }
  0xbc   :  { %v214_v28 = vsel %vm211_vm0, %v213_v25, %v209_v22 }
  0xbe   :  { %v409_v26 = vpop.eup %408 }
  0xbf   :  { %v221_v30 = vmul.f32 %v409_v26, %v214_v28 }
  0xc1   :  { %v222_v31 = vpack.c.bf16 %v221_v30, %v220_v29 }
  0xc3   :  { %299 = vmatmul.bf16.vlgmr.msra.gmra.mxu3 %v222_v31 }
 0x146   :  { %v300_v33 = vpop.f32.mrf.mxu3 }
 0x147   :  { %v301_v34 = vadd.f32 %v385_v32, %v300_v33 }
 0x149   :  { %306 = vst.msk [vmem:[%s540_s5] sm:$0xff] %vm305_vm1, %v301_v34 }
 0x14e   :  { %v302_v35 = vpop.f32.mrf.mxu3 }
 0x14f   :  { %v303_v36 = vadd.f32 %v385_v32, %v302_v35 }
 0x151   :  { %307 = vst.msk [vmem:[%s540_s5 + $0x8] sm:$0xff] %vm305_vm1, %v303_v36 }
 0x152   :  { %312 = vsyncpa [#allocation3], 1 }
 0x153   :  { %313 = vsyncpa [#allocation5], 1 }

</bundles_post_ra>
